<compile_context>
chip_gen: v5e
topology: v5e:2x2
jax: 0.10.0
libtpu: 0.0.40
codegen_flags: <defaults>
</compile_context>

<pallas_src>
import functools

import jax
import jax.numpy as jnp
from jax.experimental import pallas as pl
from jax.experimental.pallas import tpu as pltpu


# ---------------------------------------------------------------------------
# Fused Pallas kernel: whole MLP forward in one launch, all data VMEM-resident
# ---------------------------------------------------------------------------

def _vmem_spec():
    # Whole array resident in VMEM (all operands here are tiny).
    return pl.BlockSpec(memory_space=pltpu.MemorySpace.VMEM)


def make_mlp_kernel(n_hidden_layers):
    """Builds a fused kernel:
       refs = (x, w0, b0, w1, b1, ..., w_cls, b_cls, out)
       hidden layers: Linear -> ReLU (Dropout = identity)
       head:          Linear -> Sigmoid
    """

    def kernel(*refs):
        x_ref = refs[0]
        o_ref = refs[-1]
        wb = refs[1:-1]                     # alternating (weight, bias) refs

        h = x_ref[...]                      # (B, 392) f32, already in VMEM
        # --- self.mlp: [Linear -> ReLU -> Dropout] * n_hidden_layers -------
        for i in range(n_hidden_layers):    # unrolled at trace time
            w = wb[2 * i][...]              # (K, N)
            b = wb[2 * i + 1][...]          # (1, N)
            h = jnp.dot(h, w, preferred_element_type=jnp.float32) + b
            h = jnp.maximum(h, 0.0)         # ReLU; Dropout(p=0) = identity

        # --- self.binary_cls: Linear -> Sigmoid ----------------------------
        w = wb[2 * n_hidden_layers][...]    # (D_last, 1)
        b = wb[2 * n_hidden_layers + 1][...]  # (1, 1)
        y = jnp.dot(h, w, preferred_element_type=jnp.float32) + b
        # Numerically stable sigmoid via tanh (EUP slot, no exp overflow).
        o_ref[...] = 0.5 * (jnp.tanh(0.5 * y) + 1.0)

    return kernel


# ---------------------------------------------------------------------------
# Forward wrapper (weight_share=False, auxiliary=False)
# ---------------------------------------------------------------------------

@functools.partial(jax.jit, static_argnames=())
def mlp_forward(x_nchw, params):
    B = x_nchw.shape[0]
    # x.view(x.size(0), -1): pure layout glue outside the kernel.
    x_flat = x_nchw.reshape(B, -1).astype(jnp.float32)     # (B, 2*14*14)

    flat_wb = []
    for w, b in params["layers"]:
        flat_wb.extend([w, b])
    n_hidden = len(params["layers"]) - 1                    # last pair = binary_cls

    kernel = make_mlp_kernel(n_hidden)
    out = pl.pallas_call(
        kernel,
        out_shape=jax.ShapeDtypeStruct((B, 1), jnp.float32),
        in_specs=[_vmem_spec()] * (1 + len(flat_wb)),
        out_specs=_vmem_spec(),
    )(x_flat, *flat_wb)
    return out  # (B, 1), sigmoid probabilities


# ---------------------------------------------------------------------------
# Deterministic parameter init (PyTorch Linear(out,in) stored as (in,out))
# ---------------------------------------------------------------------------

def init_params(key, out_dims=(128, 64), in_features=2 * 14 * 14):
    dims = [in_features] + list(out_dims)
    n_linear = len(out_dims) + 1            # hidden linears + binary_cls
    ks = jax.random.split(key, 2 * n_linear)
    s = 0.1
    layers = []
    # hidden layers of self.mlp
    for i in range(len(out_dims)):
        w = jax.random.normal(ks[2 * i], (dims[i], dims[i + 1]), jnp.float32) * s
        b = jax.random.normal(ks[2 * i + 1], (1, dims[i + 1]), jnp.float32) * s
        layers.append((w, b))
    # binary_cls: Linear(out_dims[-1], 1)
    w = jax.random.normal(ks[-2], (dims[-1], 1), jnp.float32) * s
    b = jax.random.normal(ks[-1], (1, 1), jnp.float32) * s
    layers.append((w, b))
    return {"layers": layers}


if __name__ == "__main__":
    key = jax.random.PRNGKey(0)
    k_x, k_p = jax.random.split(key)

    # (B, 2, 14, 14): pair of 14x14 digit images, NCHW like PyTorch.
    x = jax.random.normal(k_x, (2, 2, 14, 14), jnp.float32)
    params = init_params(k_p, out_dims=(128, 64))

    out = mlp_forward(x, params)
    out = jax.block_until_ready(out)

    assert out.shape == (2, 1), out.shape
    assert bool(jnp.all((out >= 0.0) & (out <= 1.0)))   # sigmoid output range
    assert bool(jnp.all(jnp.isfinite(out)))
    # TODO(synk): nn.Dropout implemented as inference-mode identity (no RNG mask).
    print("KERNEL_OK")
</pallas_src>

<mosaic_0001>
module attributes {stable_mosaic.version = 11 : i64} {
  func.func @kernel(%arg0: memref<2x392xf32, #tpu.memory_space<vmem>>, %arg1: memref<392x128xf32, #tpu.memory_space<vmem>>, %arg2: memref<1x128xf32, #tpu.memory_space<vmem>>, %arg3: memref<128x64xf32, #tpu.memory_space<vmem>>, %arg4: memref<1x64xf32, #tpu.memory_space<vmem>>, %arg5: memref<64x1xf32, #tpu.memory_space<vmem>>, %arg6: memref<1x1xf32, #tpu.memory_space<vmem>>, %arg7: memref<2x1xf32, #tpu.memory_space<vmem>>) attributes {dimension_semantics = [], scalar_prefetch = 0 : i64, scratch_operands = 0 : i64, tpu.core_type = #tpu.core_type<tc>} {
    %c0 = arith.constant 0 : index
    %c0_0 = arith.constant 0 : index
    %0 = vector.load %arg0[%c0, %c0_0] : memref<2x392xf32, #tpu.memory_space<vmem>>, vector<2x392xf32>
    %c0_1 = arith.constant 0 : index
    %c0_2 = arith.constant 0 : index
    %1 = vector.load %arg1[%c0_1, %c0_2] : memref<392x128xf32, #tpu.memory_space<vmem>>, vector<392x128xf32>
    %c0_3 = arith.constant 0 : index
    %c0_4 = arith.constant 0 : index
    %2 = vector.load %arg2[%c0_3, %c0_4] : memref<1x128xf32, #tpu.memory_space<vmem>>, vector<1x128xf32>
    %cst = arith.constant dense<0.000000e+00> : vector<2x128xf32>
    %3 = tpu.matmul %0, %1, %cst {dimension_numbers = #tpu.dot_dimension_numbers<[1], [0], [0], [1], [0, 0, 1, 1], [], []>} : vector<2x392xf32>, vector<392x128xf32>, vector<2x128xf32> -> vector<2x128xf32>
    %4 = vector.broadcast %2 : vector<1x128xf32> to vector<2x128xf32>
    %5 = arith.addf %3, %4 : vector<2x128xf32>
    %cst_5 = arith.constant 0.000000e+00 : f32
    %6 = vector.broadcast %cst_5 : f32 to vector<2x128xf32>
    %7 = arith.maximumf %5, %6 : vector<2x128xf32>
    %c0_6 = arith.constant 0 : index
    %c0_7 = arith.constant 0 : index
    %8 = vector.load %arg3[%c0_6, %c0_7] : memref<128x64xf32, #tpu.memory_space<vmem>>, vector<128x64xf32>
    %c0_8 = arith.constant 0 : index
    %c0_9 = arith.constant 0 : index
    %9 = vector.load %arg4[%c0_8, %c0_9] : memref<1x64xf32, #tpu.memory_space<vmem>>, vector<1x64xf32>
    %cst_10 = arith.constant dense<0.000000e+00> : vector<2x64xf32>
    %10 = tpu.matmul %7, %8, %cst_10 {dimension_numbers = #tpu.dot_dimension_numbers<[1], [0], [0], [1], [0, 0, 1, 1], [], []>} : vector<2x128xf32>, vector<128x64xf32>, vector<2x64xf32> -> vector<2x64xf32>
    %11 = vector.broadcast %9 : vector<1x64xf32> to vector<2x64xf32>
    %12 = arith.addf %10, %11 : vector<2x64xf32>
    %cst_11 = arith.constant 0.000000e+00 : f32
    %13 = vector.broadcast %cst_11 : f32 to vector<2x64xf32>
    %14 = arith.maximumf %12, %13 : vector<2x64xf32>
    %c0_12 = arith.constant 0 : index
    %c0_13 = arith.constant 0 : index
    %15 = vector.load %arg5[%c0_12, %c0_13] : memref<64x1xf32, #tpu.memory_space<vmem>>, vector<64x1xf32>
    %c0_14 = arith.constant 0 : index
    %c0_15 = arith.constant 0 : index
    %16 = vector.load %arg6[%c0_14, %c0_15] : memref<1x1xf32, #tpu.memory_space<vmem>>, vector<1x1xf32>
    %cst_16 = arith.constant dense<0.000000e+00> : vector<2x1xf32>
    %17 = tpu.matmul %14, %15, %cst_16 {dimension_numbers = #tpu.dot_dimension_numbers<[1], [0], [0], [1], [0, 0, 1, 1], [], []>} : vector<2x64xf32>, vector<64x1xf32>, vector<2x1xf32> -> vector<2x1xf32>
    %18 = vector.broadcast %16 : vector<1x1xf32> to vector<2x1xf32>
    %19 = arith.addf %17, %18 : vector<2x1xf32>
    %cst_17 = arith.constant 5.000000e-01 : f32
    %20 = vector.broadcast %cst_17 : f32 to vector<2x1xf32>
    %21 = arith.mulf %20, %19 : vector<2x1xf32>
    %22 = math.tanh %21 : vector<2x1xf32>
    %cst_18 = arith.constant 1.000000e+00 : f32
    %23 = vector.broadcast %cst_18 : f32 to vector<2x1xf32>
    %24 = arith.addf %22, %23 : vector<2x1xf32>
    %cst_19 = arith.constant 5.000000e-01 : f32
    %25 = vector.broadcast %cst_19 : f32 to vector<2x1xf32>
    %26 = arith.mulf %25, %24 : vector<2x1xf32>
    %c0_20 = arith.constant 0 : index
    %c0_21 = arith.constant 0 : index
    %27 = vector.load %arg7[%c0_20, %c0_21] : memref<2x1xf32, #tpu.memory_space<vmem>>, vector<2x1xf32>
    tpu.vector_store %arg7[%c0_20, %c0_21], %26 {strides = array<i32>} : memref<2x1xf32, #tpu.memory_space<vmem>>, vector<2x1xf32>,
    return
  }
}

</mosaic_0001>

<bundles_post_ra>
// kernel: mlp_forward.1
= control target key start
LH: loop header
LB: loop body
LE: loop exit
PB: predicated region body
PF: predicated region fallthrough
CT: control target
= control target key end

     0   :  { %s448_s0 = inlined_call_operand.vmem [shape: f32[2,392], index: 0, kind: input, shape index: {}]   ;;  %s449_s1 = inlined_call_operand.hbm [shape: f32[392,128], index: 1, kind: input, shape index: {}]   ;;  %s450_s2 = inlined_call_operand.vmem [shape: f32[1,128], index: 2, kind: input, shape index: {}]   ;;  %s451_s3 = inlined_call_operand.vmem [shape: f32[128,64], index: 3, kind: input, shape index: {}]   ;;  %s452_s4 = inlined_call_operand.vmem [shape: f32[1,64], index: 4, kind: input, shape index: {}]   ;;  %s453_s5 = inlined_call_operand.vmem [shape: f32[64,1], index: 5, kind: input, shape index: {}]   ;;  %s454_s6 = inlined_call_operand.<no memory space> [shape: f32[1,1], index: 6, kind: input, shape index: {}]   ;;  %s455_s7 = inlined_call_operand.vmem [shape: f32[2,1], index: 7, kind: output, shape index: {}]  }
   0x1   :  { %v12_v0 = vstv %s454_s6 }
   0x2   :  { %13 = vst [vmem:[#allocation2] sm:$0x1] %v12_v0 }
   0x3   :  { %14 = vsyncpa [#allocation4], 0  ;;  %s21_s28 = sshll.u32 %s449_s1, 4  ;;  %s315_s29 = smov [#allocation3]   ;;  %s22_s28 = int_to_ptr.hbm [resolvable:$true] %s21_s28 }
   0x4   :  { %s23_s30 = sshll.u32 %s315_s29, 4  ;;  %s316_s8 = smov 128   ;;  %s24_s30 = int_to_ptr.vmem [resolvable:$true] %s23_s30 }
   0x5   :  { %s317_s9 = smov 8  }
   0x6   :  { %29 = dma.hbm_to_vmem [thread:$0]  %s22_s28, 6272, %s24_s30, [#allocation4], %s316_s8, %s316_s8, %s317_s9  }
   0x7   :  { %313 = dma.done.wait [#allocation4], 6272  }
   0x8   :  { %314 = vsyncadd [#allocation4], 4294961024  ;;  %v92_v1 = vld [vmem:[#allocation3 + $0x178] sm:$0xff]  ;;  %v91_v3 = vld [vmem:[#allocation3 + $0x170] sm:$0xff]  ;;  %vm107_vm0 = vcmask 64512   ;;  %vm244_vm1 = vcmask 523264  }
   0x9   :  { %v60_v2 = vld [vmem:[#allocation3 + $0x78] sm:$0xff]  ;;  %150 = vmatpush.msra.mxu2 %v92_v1  ;;  %v59_v4 = vld [vmem:[#allocation3 + $0x70] sm:$0xff]  ;;  %v90_v6 = vld [vmem:[#allocation3 + $0x168] sm:$0xff]  ;;  %vm272_vm2 = vcmask 1024  }
   0xa   :  { %110 = vmatpush.msra.mxu0 %v60_v2  ;;  %v76_v5 = vld [vmem:[#allocation3 + $0xf8] sm:$0xff]  ;;  %v58_v7 = vld [vmem:[#allocation3 + $0x68] sm:$0xff]  ;;  %v75_v8 = vld [vmem:[#allocation3 + $0xf0] sm:$0xff] }
   0xb   :  { %130 = vmatpush.msra.mxu1 %v76_v5  ;;  %151 = vmatpush.msra.mxu2 %v91_v3  ;;  %v74_v9 = vld [vmem:[#allocation3 + $0xe8] sm:$0xff]  ;;  %v89_v10 = vld [vmem:[#allocation3 + $0x160] sm:$0xff]  ;;  %v88_v13 = vld [vmem:[#allocation3 + $0x158] sm:$0xff] }
   0xc   :  { %111 = vmatpush.msra.mxu0 %v59_v4  ;;  %v57_v11 = vld [vmem:[#allocation3 + $0x60] sm:$0xff]  ;;  %v56_v14 = vld [vmem:[#allocation3 + $0x58] sm:$0xff]  ;;  %v87_v16 = vld [vmem:[#allocation3 + $0x150] sm:$0xff] }
   0xd   :  { %131 = vmatpush.msra.mxu1 %v75_v8  ;;  %152 = vmatpush.msra.mxu2 %v90_v6  ;;  %v73_v12 = vld [vmem:[#allocation3 + $0xe0] sm:$0xff]  ;;  %v72_v15 = vld [vmem:[#allocation3 + $0xd8] sm:$0xff]  ;;  %v55_v17 = vld [vmem:[#allocation3 + $0x50] sm:$0xff] }
   0xe   :  { %112 = vmatpush.msra.mxu0 %v58_v7  ;;  %v71_v18 = vld [vmem:[#allocation3 + $0xd0] sm:$0xff]  ;;  %v86_v19 = vld [vmem:[#allocation3 + $0x148] sm:$0xff]  ;;  %v85_v22 = vld [vmem:[#allocation3 + $0x140] sm:$0xff] }
   0xf   :  { %132 = vmatpush.msra.mxu1 %v74_v9  ;;  %153 = vmatpush.msra.mxu2 %v89_v10  ;;  %v54_v20 = vld [vmem:[#allocation3 + $0x48] sm:$0xff]  ;;  %v53_v23 = vld [vmem:[#allocation3 + $0x40] sm:$0xff]  ;;  %v84_v25 = vld [vmem:[#allocation3 + $0x138] sm:$0xff] }
  0x10   :  { %113 = vmatpush.msra.mxu0 %v57_v11  ;;  %v70_v21 = vld [vmem:[#allocation3 + $0xc8] sm:$0xff]  ;;  %v69_v24 = vld [vmem:[#allocation3 + $0xc0] sm:$0xff]  ;;  %v52_v26 = vld [vmem:[#allocation3 + $0x38] sm:$0xff] }
  0x11   :  { %133 = vmatpush.msra.mxu1 %v73_v12  ;;  %154 = vmatpush.msra.mxu2 %v88_v13  ;;  %v68_v27 = vld [vmem:[#allocation3 + $0xb8] sm:$0xff]  ;;  %v83_v29 = vld [vmem:[#allocation3 + $0x130] sm:$0xff]  ;;  %v93_v31 = vld [vmem:[#allocation3 + $0x180] sm:$0xff] }
  0x12   :  { %114 = vmatpush.msra.mxu0 %v56_v14  ;;  %v44_v28 = vld [vmem:[%s448_s0] sm:$0xff]  ;;  %v206_v33 = vld [vmem:[%s451_s3 + $0x78] sm:$0xff]  ;;  %185 = vmatpush.msra.mxu3 %v93_v31  ;;  %v81_v36 = vld [vmem:[#allocation3 + $0x120] sm:$0xff] }
  0x13   :  { %134 = vmatpush.msra.mxu1 %v72_v15  ;;  %155 = vmatpush.msra.mxu2 %v87_v16  ;;  %v51_v30 = vld [vmem:[#allocation3 + $0x30] sm:$0xff]  ;;  %99 = vst [vmem:[#allocation1] ss:$4 sm:$0xff] %v44_v28  ;;  %v82_v34 = vld [vmem:[#allocation3 + $0x128] sm:$0xff]  ;;  %v49_v39 = vld [vmem:[#allocation3 + $0x20] sm:$0xff] }
  0x14   :  { %115 = vmatpush.msra.mxu0 %v55_v17  ;;  %v67_v32 = vld [vmem:[#allocation3 + $0xb0] sm:$0xff]  ;;  %v50_v35 = vld [vmem:[#allocation3 + $0x28] sm:$0xff]  ;;  %211 = vmatpush.msrb.mxu3 %v206_v33  ;;  %v65_v40 = vld [vmem:[#allocation3 + $0xa0] sm:$0xff] }
  0x15   :  { %135 = vmatpush.msra.mxu1 %v71_v18  ;;  %156 = vmatpush.msra.mxu2 %v86_v19  ;;  %v66_v37 = vld [vmem:[#allocation3 + $0xa8] sm:$0xff]  ;;  %v204_v41 = vld [vmem:[%s451_s3 + $0x68] sm:$0xff]  ;;  %v79_v45 = vld [vmem:[#allocation3 + $0x110] sm:$0xff] }
  0x16   :  { %116 = vmatpush.msra.mxu0 %v54_v20  ;;  %v205_v38 = vld [vmem:[%s451_s3 + $0x70] sm:$0xff]  ;;  %v80_v42 = vld [vmem:[#allocation3 + $0x118] sm:$0xff]  ;;  %v47_v46 = vld [vmem:[#allocation3 + $0x10] sm:$0xff] }
  0x17   :  { %136 = vmatpush.msra.mxu1 %v70_v21  ;;  %157 = vmatpush.msra.mxu2 %v85_v22  ;;  %v48_v43 = vld [vmem:[#allocation3 + $0x18] sm:$0xff]  ;;  %v63_v48 = vld [vmem:[#allocation3 + $0x90] sm:$0xff]  ;;  %v78_v50 = vld [vmem:[#allocation3 + $0x108] sm:$0xff] }
  0x18   :  { %117 = vmatpush.msra.mxu0 %v53_v23  ;;  %212 = vmatpush.msrb.mxu3 %v205_v38  ;;  %v64_v44 = vld [vmem:[#allocation3 + $0x98] sm:$0xff]  ;;  %v46_v51 = vld [vmem:[#allocation3 + $0x8] sm:$0xff]  ;;  %v77_v54 = vld [vmem:[#allocation3 + $0x100] sm:$0xff] }
  0x19   :  { %137 = vmatpush.msra.mxu1 %v69_v24  ;;  %158 = vmatpush.msra.mxu2 %v84_v25  ;;  %v203_v49 = vld [vmem:[%s451_s3 + $0x60] sm:$0xff]  ;;  %v62_v52 = vld [vmem:[#allocation3 + $0x88] sm:$0xff]  ;;  %v45_v55 = vld [vmem:[#allocation3] sm:$0xff] }
  0x1a   :  { %118 = vmatpush.msra.mxu0 %v52_v26  ;;  %v103_v47 = vld.sshfl [vmem:[#allocation1 + $0x18] sm:$0xff pattern:$0x73625140]  ;;  %213 = vmatpush.msrb.mxu3 %v204_v41  ;;  %v102_v56 = vld.sshfl [vmem:[#allocation1 + $0x10] sm:$0xff pattern:$0x73625140] }
  0x1b   :  { %138 = vmatpush.msra.mxu1 %v68_v27  ;;  %159 = vmatpush.msra.mxu2 %v83_v29  ;;  %v202_v53 = vld [vmem:[%s451_s3 + $0x58] sm:$0xff]  ;;  %v100_v57 = vld.sshfl [vmem:[#allocation1] sm:$0xff pattern:$0x73625140]  ;;  %v61_v58 = vld [vmem:[#allocation3 + $0x80] sm:$0xff] }
  0x1c   :  { %119 = vmatpush.msra.mxu0 %v51_v30  ;;  %279 = vmatmul.msk.f32.vlgmr.msra.gmra.mxu3 %vm107_vm0, %v103_v47  ;;  %v201_v59 = vld [vmem:[%s451_s3 + $0x50] sm:$0xff]  ;;  %v101_v60 = vld.sshfl [vmem:[#allocation1 + $0x8] sm:$0xff pattern:$0x73625140]  ;;  %v199_v62 = vld [vmem:[%s451_s3 + $0x40] sm:$0xff] }
  0x1d   :  { %139 = vmatpush.msra.mxu1 %v67_v32  ;;  %160 = vmatpush.msra.mxu2 %v82_v34  ;;  %v200_v61 = vld [vmem:[%s451_s3 + $0x48] sm:$0xff]  ;;  %v198_v63 = vld [vmem:[%s451_s3 + $0x38] sm:$0xff]  ;;  %v197_v0 = vld [vmem:[%s451_s3 + $0x30] sm:$0xff] }
  0x1e   :  { %120 = vmatpush.msra.mxu0 %v50_v35  ;;  %214 = vmatpush.msrb.mxu3 %v203_v49  ;;  %v196_v1 = vld [vmem:[%s451_s3 + $0x28] sm:$0xff]  ;;  %v195_v2 = vld [vmem:[%s451_s3 + $0x20] sm:$0xff]  ;;  %v194_v3 = vld [vmem:[%s451_s3 + $0x18] sm:$0xff] }
  0x1f   :  { %140 = vmatpush.msra.mxu1 %v66_v37  ;;  %161 = vmatpush.msra.mxu2 %v81_v36  ;;  %v193_v4 = vld [vmem:[%s451_s3 + $0x10] sm:$0xff]  ;;  %v192_v5 = vld [vmem:[%s451_s3 + $0x8] sm:$0xff]  ;;  %v191_v6 = vld [vmem:[%s451_s3] sm:$0xff] }
  0x20   :  { %121 = vmatpush.msra.mxu0 %v49_v39  ;;  %215 = vmatpush.msrb.mxu3 %v202_v53  ;;  %v239_v7 = vld [vmem:[%s453_s5 + $0x38] sm:$0xff]  ;;  %v238_v8 = vld [vmem:[%s453_s5 + $0x30] sm:$0xff]  ;;  %v237_v9 = vld [vmem:[%s453_s5 + $0x28] sm:$0xff] }
  0x21   :  { %141 = vmatpush.msra.mxu1 %v65_v40  ;;  %162 = vmatpush.msra.mxu2 %v80_v42  ;;  %v236_v10 = vld [vmem:[%s453_s5 + $0x20] sm:$0xff]  ;;  %v235_v11 = vld [vmem:[%s453_s5 + $0x18] sm:$0xff]  ;;  %v234_v22 = vld [vmem:[%s453_s5 + $0x10] sm:$0xff] }
  0x22   :  { %122 = vmatpush.msra.mxu0 %v48_v43  ;;  %216 = vmatpush.msrb.mxu3 %v201_v59  ;;  %v284_v12 = vld [vmem:[%s450_s2] ss:$0 sm:$0xff]  ;;  %v233_v23 = vld [vmem:[%s453_s5 + $0x8] sm:$0xff] }
  0x23   :  { %142 = vmatpush.msra.mxu1 %v64_v44  ;;  %163 = vmatpush.msra.mxu2 %v79_v45  ;;  %v232_v24 = vld [vmem:[%s453_s5] sm:$0xff]  ;;  %v286_v29 = vld [vmem:[#allocation2] ss:$0 sm:$0xff] }
  0x24   :  { %123 = vmatpush.msra.mxu0 %v47_v46  ;;  %217 = vmatpush.msrb.mxu3 %v200_v61  ;;  %v285_v25 = vld [vmem:[%s452_s4] ss:$0 sm:$0xff] }
  0x25   :  { %143 = vmatpush.msra.mxu1 %v63_v48  ;;  %164 = vmatpush.msra.mxu2 %v78_v50 }
  0x26   :  { %124 = vmatpush.msra.mxu0 %v46_v51  ;;  %218 = vmatpush.msrb.mxu3 %v199_v62 }
  0x27   :  { %144 = vmatpush.msra.mxu1 %v62_v52  ;;  %165 = vmatpush.msra.mxu2 %v77_v54 }
  0x28   :  { %125 = vmatpush.msra.mxu0 %v45_v55  ;;  %166 = vmatmul.f32.vlgmr.msra.gmra.mxu2 %v102_v56 }
  0x29   :  { %126 = vmatmul.f32.vlgmr.msra.gmra.mxu0 %v100_v57  ;;  %145 = vmatpush.msra.mxu1 %v61_v58 }
  0x2a   :  { %146 = vmatmul.f32.vlgmr.msra.gmra.mxu1 %v101_v60  ;;  %219 = vmatpush.msrb.mxu3 %v198_v63 }
  0x2b   :  { %256 = vmatpush.msrb.mxu0 %v239_v7 }
  0x2c   :  { %220 = vmatpush.msrb.mxu3 %v197_v0 }
  0x2d   :  { %257 = vmatpush.msrb.mxu0 %v238_v8 }
  0x2e   :  { %221 = vmatpush.msrb.mxu3 %v196_v1 }
  0x2f   :  { %258 = vmatpush.msrb.mxu0 %v237_v9 }
  0x30   :  { %222 = vmatpush.msrb.mxu3 %v195_v2 }
  0x31   :  { %259 = vmatpush.msrb.mxu0 %v236_v10 }
  0x32   :  { %223 = vmatpush.msrb.mxu3 %v194_v3 }
  0x33   :  { %260 = vmatpush.msrb.mxu0 %v235_v11 }
  0x34   :  { %224 = vmatpush.msrb.mxu3 %v193_v4 }
  0x35   :  { %261 = vmatpush.msrb.mxu0 %v234_v22 }
  0x36   :  { %225 = vmatpush.msrb.mxu3 %v192_v5 }
  0x37   :  { %262 = vmatpush.msrb.mxu0 %v233_v23 }
  0x38   :  { %226 = vmatpush.msrb.mxu3 %v191_v6 }
  0x39   :  { %263 = vmatpush.msrb.mxu0 %v232_v24 }
  0x9f   :  { %v187_v18 = vpop.f32.mrf.mxu3 }
  0xa6   :  { %v127_v13 = vpop.f32.mrf.mxu0 }
  0xa7   :  { %v128_v14 = vadd.f32 %v284_v12, %v127_v13  ;;  %v147_v15 = vpop.f32.mrf.mxu1 }
  0xa9   :  { %v148_v16 = vadd.f32 %v147_v15, %v128_v14 }
  0xab   :  { %v167_v17 = vpop.f32.mrf.mxu2 }
  0xac   :  { %v168_v19 = vadd.f32 %v167_v17, %v148_v16 }
  0xae   :  { %v188_v20 = vadd.f32 %v187_v18, %v168_v19 }
  0xb0   :  { %v190_v21 = vmax.f32 %v188_v20, 0.0 }
  0xb2   :  { %227 = vmatmul.f32.vlgmr.msrb.gmra.mxu3 %v190_v21 }
 0x135   :  { %v228_v26 = vpop.f32.mrf.mxu3 }
 0x136   :  { %v229_v27 = vadd.f32 %v285_v25, %v228_v26 }
 0x138   :  { %v231_v28 = vmax.f32 %v229_v27, 0.0 }
 0x13a   :  { %280 = vmatmul.msk.f32.vlgmr.msrb.gmra.mxu0 %vm244_vm1, %v231_v28 }
 0x1b7   :  { %v265_v30 = vpop.f32.mrf.mxu0 }
 0x1b8   :  { %v266_v31 = vadd.f32 %v286_v29, %v265_v30 }
 0x1ba   :  { %v268_v32 = vmul.f32 0.5, %v266_v31 }
 0x1bc   :  { %287 = vtanh.f32 %v268_v32 }
 0x1c2   :  { %v288_v33 = vpop.eup %287 }
 0x1c3   :  { %v270_v34 = vadd.f32 1.0, %v288_v33 }
 0x1c5   :  { %v271_v35 = vmul.f32 0.5, %v270_v34 }
 0x1c7   :  { %273 = vst.msk [vmem:[%s455_s7] sm:$0x3] %vm272_vm2, %v271_v35 }
 0x1c8   :  { %278 = vsyncpa [#allocation4], 1 }

</bundles_post_ra>
